<compile_context>
chip_gen: v5e
topology: v5e:2x2
jax: 0.10.0
libtpu: 0.0.40
codegen_flags: <defaults>
</compile_context>

<pallas_src>
import functools

import jax
import jax.numpy as jnp
from jax import lax
from jax.experimental import pallas as pl
from jax.experimental.pallas import tpu as pltpu


# ----------------------------------------------------------------------------
# Kernel
# ----------------------------------------------------------------------------
def _aam_stats_kernel(emb_ref, inv_e_ref, labels_ref, w_ref,
                      m_ref, l_ref, t_ref, *,
                      margin_scale, num_classes, class_tile,
                      tiles_per_split, batch, mask_padded):
    i = pl.program_id(1)                       # class tile within this split
    tile = pl.program_id(0) * tiles_per_split + i

    @pl.when(i == 0)
    def _init():                               # per-split online-LSE init
        m_ref[0] = jnp.full((batch, 1), -jnp.inf, jnp.float32)
        l_ref[0] = jnp.zeros((batch, 1), jnp.float32)
        t_ref[0] = jnp.zeros((batch, 1), jnp.float32)

    # ---- current streamed class tile --------------------------------------
    w = w_ref[...]                                             # (TC, D)
    w32 = w.astype(jnp.float32)
    # torch F.normalize: w / max(||w||, 1e-12) == w * rsqrt(max(||w||^2, 1e-24))
    inv_w = lax.rsqrt(jnp.maximum(jnp.sum(w32 * w32, axis=-1), 1e-24))  # (TC,)

    # MXU matmul on raw operands; contraction over shared D (trans_b form).
    dots = lax.dot_general(
        emb_ref[...], w,
        dimension_numbers=(((1,), (1,)), ((), ())),
        preferred_element_type=jnp.float32)                    # (B, TC) f32

    # `scale` is pre-folded into inv_e (wrapper) -> cos_scaled = scale * cos.
    cos_s = dots * inv_e_ref[...] * inv_w[None, :]             # (B, TC)

    col = jax.lax.broadcasted_iota(jnp.int32, (batch, class_tile), 1) \
        + tile * class_tile
    tgt = col == labels_ref[...]               # labels assumed in [0, C)
    logits = jnp.where(tgt, cos_s - margin_scale, cos_s)
    if mask_padded:
        # NB: this select must stay AFTER cos_s — it is what keeps garbage
        # from out-of-range weight rows (partial last tile / clamped padding
        # tiles) out of the log-sum-exp.
        logits = jnp.where(col < num_classes, logits, -jnp.inf)

    # ---- online (flash) log-sum-exp across class tiles ---------------------
    m_old = m_ref[0]
    m_new = jnp.maximum(m_old, jnp.max(logits, axis=-1, keepdims=True))
    alpha = jnp.exp(m_old - m_new)
    l_ref[0] = alpha * l_ref[0] + jnp.sum(jnp.exp(logits - m_new),
                                          axis=-1, keepdims=True)
    m_ref[0] = m_new
    t_ref[0] = t_ref[0] + jnp.sum(jnp.where(tgt, logits, 0.0),
                                  axis=-1, keepdims=True)


# ----------------------------------------------------------------------------
# Hardware-aware sizing helpers
# ----------------------------------------------------------------------------
def _tpu_generation_info():
    """(per-core VMEM bytes, TensorCores per chip) with safe fallbacks."""
    vmem_bytes = 128 << 20
    num_cores = 1
    try:
        info = pltpu.get_tpu_info()
        v = int(getattr(info, "vmem_capacity_bytes", vmem_bytes))
        if v > 0:
            vmem_bytes = v
        for attr in ("num_tensorcores", "tensorcore_count", "num_cores",
                     "core_count"):
            val = getattr(info, attr, None)
            if val:
                num_cores = int(val)
                break
    except Exception:
        pass
    return vmem_bytes, num_cores


def _pick_tile_and_vmem(b_pad, d, c, itemsize, requested_tile, n_wbuf, vmem_cap):
    """Budget-driven, 256-aligned class tile + matching vmem_limit_bytes."""
    if vmem_cap >= (96 << 20):        # v5e / v6e: 128 MiB physical per core
        limit_cap = 100 << 20
        weight_target = 16 << 20
    else:                             # v7x-like: 64 MiB physical per core
        limit_cap = 48 << 20
        weight_target = 8 << 20

    # Honest per-step VMEM accounting (review item):
    fixed = (2 * b_pad * d * itemsize          # resident embeddings (2 bufs)
             + 16 * b_pad * 4                  # labels, inv_e, (m,l,t) outputs
             + (2 << 20))                      # compiler-internal slack
    per_tc = (n_wbuf * d * itemsize            # streamed weight buffers
              + 2 * d * 4                      # f32 cast / square temporaries
              + 8 * b_pad * 4)                 # live (B, TC) epilogue arrays
    budget = limit_cap - (4 << 20)
    tc_budget = max(8, (budget - fixed) // per_tc)
    tc_target = max(8, weight_target // max(1, d * itemsize))
    tc = min(tc_budget, tc_target if requested_tile is None
             else int(requested_tile))

    # MXU / lane alignment: full C if it fits, else multiples of 256 (128 floor).
    if tc >= c:
        tc = c
    elif tc >= 256:
        tc = (tc // 256) * 256
    elif tc >= 128:
        tc = 128
    else:
        tc = max(8, (tc // 8) * 8)             # tiny-budget / explicit-tile fallback

    est = fixed + tc * per_tc
    vmem_limit = int(min(limit_cap, max(32 << 20, est + (4 << 20))))
    return int(tc), vmem_limit


def _pick_class_splits(requested, n_tiles, vmem_cap, num_cores):
    if requested is not None:
        s = int(requested)
    elif num_cores >= 2 or vmem_cap <= (80 << 20):
        # v7x-like part (two TensorCores): split the class range across both
        # cores; weight HBM traffic is unchanged, compute throughput ~2x.
        s = 2
    else:
        s = 1
    s = max(1, min(s, 2, max(1, n_tiles)))
    # Every split's FIRST tile must contain at least one real class column,
    # otherwise its online-LSE init would see an all-masked tile.
    while s > 1 and (s - 1) * ((n_tiles + s - 1) // s) >= n_tiles:
        s -= 1
    return s


# ----------------------------------------------------------------------------
# Wrapper
# ----------------------------------------------------------------------------
def additive_angular_margin_loss(embeddings, weight, labels, *,
                                 margin=0.2, scale=30.0,
                                 class_tile=None, use_bf16_matmul=True,
                                 num_class_splits=None, weight_buffer_count=2):
    """Scalar CosFace/AAM cross-entropy loss as a single Pallas TPU kernel."""
    b, d = embeddings.shape
    c, d2 = weight.shape
    assert d == d2, (embeddings.shape, weight.shape)

    mxu_dtype = jnp.bfloat16 if use_bf16_matmul else jnp.float32
    itemsize = jnp.dtype(mxu_dtype).itemsize

    # --- batch padded to the MXU sublane multiple of the streaming dtype ----
    sublane = 16 if itemsize == 2 else 8
    b_pad = ((b + sublane - 1) // sublane) * sublane
    e32 = embeddings.astype(jnp.float32)
    lbl = labels.astype(jnp.int32)
    if b_pad != b:
        e32 = jnp.pad(e32, ((0, b_pad - b), (0, 0)))
        lbl = jnp.pad(lbl, (0, b_pad - b))
    labels2d = lbl.reshape(b_pad, 1)

    # Full-f32 row norms (torch F.normalize semantics) with `scale` folded in,
    # computed from the un-truncated embeddings even on the bf16 MXU path.
    e_sq = jnp.sum(e32 * e32, axis=-1, keepdims=True)
    inv_e_scaled = float(scale) * lax.rsqrt(jnp.maximum(e_sq, 1e-24))

    emb = e32.astype(mxu_dtype)
    w = weight.astype(mxu_dtype)

    # --- generation-aware tiling / VMEM budget -------------------------------
    vmem_cap, num_cores = _tpu_generation_info()
    tc, vmem_limit = _pick_tile_and_vmem(b_pad, d, c, itemsize, class_tile,
                                         int(weight_buffer_count), vmem_cap)
    n_tiles = int(pl.cdiv(c, tc))
    n_splits = _pick_class_splits(num_class_splits, n_tiles, vmem_cap, num_cores)
    tiles_per_split = (n_tiles + n_splits - 1) // n_splits
    mask_padded = (n_splits * tiles_per_split * tc) > c

    kernel = functools.partial(
        _aam_stats_kernel,
        margin_scale=float(margin) * float(scale),
        num_classes=c, class_tile=tc, tiles_per_split=tiles_per_split,
        batch=b_pad, mask_padded=mask_padded)

    def w_index_map(s, i):
        # Clamp fully out-of-range padding tiles (last split, uneven n_tiles)
        # onto the last valid block so no OOB DMA is ever issued; their
        # columns are masked to -inf inside the kernel.
        return (jnp.minimum(s * tiles_per_split + i, n_tiles - 1), 0)

    w_spec_kwargs = {}
    if int(weight_buffer_count) != 2:
        # Deeper weight pipelining (e.g. pl.Buffered(3) on v7x if xprof shows
        # exposed DMA between grid steps).
        w_spec_kwargs["pipeline_mode"] = pl.Buffered(int(weight_buffer_count))

    stat_shape = jax.ShapeDtypeStruct((n_splits, b_pad, 1), jnp.float32)

    def stat_spec():
        return pl.BlockSpec((1, b_pad, 1), lambda s, i: (s, 0, 0))

    m_out, l_out, t_out = pl.pallas_call(
        kernel,
        out_shape=(stat_shape, stat_shape, stat_shape),
        grid_spec=pltpu.PrefetchScalarGridSpec(
            num_scalar_prefetch=0,
            grid=(n_splits, tiles_per_split),
            in_specs=[
                pl.BlockSpec((b_pad, d), lambda s, i: (0, 0)),   # embeddings
                pl.BlockSpec((b_pad, 1), lambda s, i: (0, 0)),   # scale/||e||
                pl.BlockSpec((b_pad, 1), lambda s, i: (0, 0)),   # labels
                pl.BlockSpec((tc, d), w_index_map, **w_spec_kwargs),  # weight
            ],
            out_specs=(stat_spec(), stat_spec(), stat_spec())),
        compiler_params=pltpu.CompilerParams(
            dimension_semantics=("parallel", "arbitrary"),
            vmem_limit_bytes=vmem_limit),
    )(emb, inv_e_scaled, labels2d, w)

    # Combine per-split online-LSE stats (tiny (S, B) math) -> scalar loss.
    m_s = m_out[:, :b, 0]
    l_s = l_out[:, :b, 0]
    t_s = t_out[:, :b, 0]
    lse = jax.nn.logsumexp(m_s + jnp.log(l_s), axis=0)          # (B,)
    return jnp.mean(lse - jnp.sum(t_s, axis=0))


# ----------------------------------------------------------------------------
# Reference + tests
# ----------------------------------------------------------------------------
def xavier_uniform(key, out_features, in_features, dtype=jnp.float32):
    # deterministic stand-in for nn.init.xavier_uniform_
    bound = jnp.sqrt(6.0 / (in_features + out_features))
    return jax.random.uniform(key, (out_features, in_features),
                              minval=-bound, maxval=bound, dtype=dtype)


def _reference_loss(emb, w, lbl, margin, scale):
    emb_n = emb / jnp.maximum(jnp.linalg.norm(emb, axis=-1, keepdims=True), 1e-12)
    w_n = w / jnp.maximum(jnp.linalg.norm(w, axis=-1, keepdims=True), 1e-12)
    cos = emb_n @ w_n.T
    one_hot = jax.nn.one_hot(lbl, w.shape[0], dtype=bool)
    logits = jnp.where(one_hot, cos - margin, cos) * scale
    return jnp.mean(jax.nn.logsumexp(logits, axis=-1)
                    - jnp.sum(jnp.where(one_hot, logits, 0.0), axis=-1))


if __name__ == "__main__":
    batch = 8
    in_features = 32
    out_features = 16
    margin = 0.2
    scale = 30.0

    key = jax.random.PRNGKey(0)
    k_emb, k_w, k_lbl = jax.random.split(key, 3)

    embeddings = jax.random.normal(k_emb, (batch, in_features), dtype=jnp.float32)
    weight = xavier_uniform(k_w, out_features, in_features)
    labels = jax.random.randint(k_lbl, (batch,), 0, out_features, dtype=jnp.int32)

    ref = _reference_loss(embeddings, weight, labels, margin, scale)

    # 1) f32 MXU path, single full class tile — tight check.
    loss_f32 = additive_angular_margin_loss(
        embeddings, weight, labels, margin=margin, scale=scale,
        use_bf16_matmul=False)
    jax.block_until_ready(loss_f32)
    assert jnp.allclose(loss_f32, ref, atol=1e-4, rtol=1e-4), (loss_f32, ref)

    # 2) bf16 MXU fast path (f32 row norms from the wrapper) — loose check.
    loss_bf16 = additive_angular_margin_loss(
        embeddings, weight, labels, margin=margin, scale=scale,
        use_bf16_matmul=True)
    jax.block_until_ready(loss_bf16)
    assert jnp.allclose(loss_bf16, ref, atol=1e-1, rtol=1e-1), (loss_bf16, ref)

    # 3) multi-tile class streaming + partial last tile (256-aligned tiles).
    big_c = 640
    w_big = xavier_uniform(jax.random.PRNGKey(1), big_c, in_features)
    lbl_big = jax.random.randint(jax.random.PRNGKey(2), (batch,), 0, big_c,
                                 dtype=jnp.int32)
    ref_big = _reference_loss(embeddings, w_big, lbl_big, margin, scale)
    loss_tiled = additive_angular_margin_loss(
        embeddings, w_big, lbl_big, margin=margin, scale=scale,
        use_bf16_matmul=False, class_tile=256)
    jax.block_until_ready(loss_tiled)
    assert jnp.allclose(loss_tiled, ref_big, atol=5e-4, rtol=5e-4), (loss_tiled,
                                                                     ref_big)

    # 4) dual class-split (v7x dual-TC path; correct on 1-TC chips too) —
    #    also exercises the clamped fully-out-of-range padding tile.
    loss_split = additive_angular_margin_loss(
        embeddings, w_big, lbl_big, margin=margin, scale=scale,
        use_bf16_matmul=False, class_tile=256, num_class_splits=2)
    jax.block_until_ready(loss_split)
    assert jnp.allclose(loss_split, ref_big, atol=5e-4, rtol=5e-4), (loss_split,
                                                                     ref_big)

    # 5) odd batch size on the bf16 path (exercises batch sublane padding).
    emb_odd = embeddings[:5]
    lbl_odd = labels[:5]
    ref_odd = _reference_loss(emb_odd, weight, lbl_odd, margin, scale)
    loss_odd = additive_angular_margin_loss(
        emb_odd, weight, lbl_odd, margin=margin, scale=scale,
        use_bf16_matmul=True)
    jax.block_until_ready(loss_odd)
    assert jnp.allclose(loss_odd, ref_odd, atol=1e-1, rtol=1e-1), (loss_odd,
                                                                   ref_odd)

    print("KERNEL_OK")
</pallas_src>

<mosaic_0001>
module attributes {stable_mosaic.version = 11 : i64} {
  func.func @_aam_stats_kernel(%arg0: i32, %arg1: i32, %arg2: memref<8x32xf32, #tpu.memory_space<vmem>>, %arg3: memref<8x1xf32, #tpu.memory_space<vmem>>, %arg4: memref<8x1xi32, #tpu.memory_space<vmem>>, %arg5: memref<16x32xf32, #tpu.memory_space<vmem>>, %arg6: memref<1x8x1xf32, #tpu.memory_space<vmem>>, %arg7: memref<1x8x1xf32, #tpu.memory_space<vmem>>, %arg8: memref<1x8x1xf32, #tpu.memory_space<vmem>>) attributes {dimension_semantics = [#tpu.dimension_semantics<parallel>, #tpu.dimension_semantics<arbitrary>], iteration_bounds = array<i64: 1, 1>, scalar_prefetch = 0 : i64, scratch_operands = 0 : i64, tpu.core_type = #tpu.core_type<tc>, window_params = [{pipeline_mode = #tpu.pipeline_mode<synchronous>, transform_indices = @transform_0, window_bounds = array<i64: 8, 32>}, {pipeline_mode = #tpu.pipeline_mode<synchronous>, transform_indices = @transform_1, window_bounds = array<i64: 8, 1>}, {pipeline_mode = #tpu.pipeline_mode<synchronous>, transform_indices = @transform_2, window_bounds = array<i64: 8, 1>}, {transform_indices = @transform_3, window_bounds = array<i64: 16, 32>}, {transform_indices = @transform_4, window_bounds = array<i64: 1, 8, 1>}, {transform_indices = @transform_5, window_bounds = array<i64: 1, 8, 1>}, {transform_indices = @transform_6, window_bounds = array<i64: 1, 8, 1>}]} {
    %c1_i32 = arith.constant 1 : i32
    %0 = arith.muli %arg0, %c1_i32 : i32
    %1 = arith.addi %0, %arg1 : i32
    %c0_i32 = arith.constant 0 : i32
    %2 = arith.cmpi eq, %arg1, %c0_i32 : i32
    %3 = arith.extui %2 : i1 to i32
    %c0_i32_0 = arith.constant 0 : i32
    %4 = arith.cmpi ne, %3, %c0_i32_0 : i32
    scf.if %4 {
      %cst_33 = arith.constant 0xFF800000 : f32
      %61 = vector.broadcast %cst_33 : f32 to vector<8x1xf32>
      %c0_34 = arith.constant 0 : index
      %c0_35 = arith.constant 0 : index
      %c0_36 = arith.constant 0 : index
      %62 = vector.load %arg6[%c0_34, %c0_35, %c0_36] : memref<1x8x1xf32, #tpu.memory_space<vmem>>, vector<1x8x1xf32>
      %63 = vector.shape_cast %62 : vector<1x8x1xf32> to vector<8x1xf32>
      %64 = vector.shape_cast %61 : vector<8x1xf32> to vector<1x8x1xf32>
      tpu.vector_store %arg6[%c0_34, %c0_35, %c0_36], %64 {strides = array<i32>} : memref<1x8x1xf32, #tpu.memory_space<vmem>>, vector<1x8x1xf32>,
      %cst_37 = arith.constant 0.000000e+00 : f32
      %65 = vector.broadcast %cst_37 : f32 to vector<8x1xf32>
      %c0_38 = arith.constant 0 : index
      %c0_39 = arith.constant 0 : index
      %c0_40 = arith.constant 0 : index
      %66 = vector.load %arg7[%c0_38, %c0_39, %c0_40] : memref<1x8x1xf32, #tpu.memory_space<vmem>>, vector<1x8x1xf32>
      %67 = vector.shape_cast %66 : vector<1x8x1xf32> to vector<8x1xf32>
      %68 = vector.shape_cast %65 : vector<8x1xf32> to vector<1x8x1xf32>
      tpu.vector_store %arg7[%c0_38, %c0_39, %c0_40], %68 {strides = array<i32>} : memref<1x8x1xf32, #tpu.memory_space<vmem>>, vector<1x8x1xf32>,
      %cst_41 = arith.constant 0.000000e+00 : f32
      %69 = vector.broadcast %cst_41 : f32 to vector<8x1xf32>
      %c0_42 = arith.constant 0 : index
      %c0_43 = arith.constant 0 : index
      %c0_44 = arith.constant 0 : index
      %70 = vector.load %arg8[%c0_42, %c0_43, %c0_44] : memref<1x8x1xf32, #tpu.memory_space<vmem>>, vector<1x8x1xf32>
      %71 = vector.shape_cast %70 : vector<1x8x1xf32> to vector<8x1xf32>
      %72 = vector.shape_cast %69 : vector<8x1xf32> to vector<1x8x1xf32>
      tpu.vector_store %arg8[%c0_42, %c0_43, %c0_44], %72 {strides = array<i32>} : memref<1x8x1xf32, #tpu.memory_space<vmem>>, vector<1x8x1xf32>,
    } else {
    }
    %c0 = arith.constant 0 : index
    %c0_1 = arith.constant 0 : index
    %5 = vector.load %arg5[%c0, %c0_1] : memref<16x32xf32, #tpu.memory_space<vmem>>, vector<16x32xf32>
    %6 = arith.mulf %5, %5 : vector<16x32xf32>
    %cst = arith.constant dense<0.000000e+00> : vector<16xf32>
    %7 = vector.multi_reduction <add>, %6, %cst [1] : vector<16x32xf32> to vector<16xf32>
    %cst_2 = arith.constant 1.000000e-24 : f32
    %8 = vector.broadcast %cst_2 : f32 to vector<16xf32>
    %9 = arith.maximumf %7, %8 : vector<16xf32>
    %10 = math.rsqrt %9 : vector<16xf32>
    %c0_3 = arith.constant 0 : index
    %c0_4 = arith.constant 0 : index
    %11 = vector.load %arg2[%c0_3, %c0_4] : memref<8x32xf32, #tpu.memory_space<vmem>>, vector<8x32xf32>
    %cst_5 = arith.constant dense<0.000000e+00> : vector<8x16xf32>
    %12 = tpu.matmul %11, %5, %cst_5 {dimension_numbers = #tpu.dot_dimension_numbers<[1], [1], [0], [0], [0, 0, 1, 0], [], []>} : vector<8x32xf32>, vector<16x32xf32>, vector<8x16xf32> -> vector<8x16xf32>
    %c0_6 = arith.constant 0 : index
    %c0_7 = arith.constant 0 : index
    %13 = vector.load %arg3[%c0_6, %c0_7] : memref<8x1xf32, #tpu.memory_space<vmem>>, vector<8x1xf32>
    %14 = vector.broadcast %13 : vector<8x1xf32> to vector<8x16xf32>
    %15 = arith.mulf %12, %14 : vector<8x16xf32>
    %16 = vector.shape_cast %10 : vector<16xf32> to vector<1x16xf32>
    %17 = vector.broadcast %16 : vector<1x16xf32> to vector<8x16xf32>
    %18 = arith.mulf %15, %17 : vector<8x16xf32>
    %19 = tpu.iota {dimensions = array<i32: 1>} : vector<8x16xi32>
    %c16_i32 = arith.constant 16 : i32
    %20 = arith.muli %1, %c16_i32 : i32
    %21 = vector.broadcast %20 : i32 to vector<8x16xi32>
    %22 = arith.addi %19, %21 : vector<8x16xi32>
    %c0_8 = arith.constant 0 : index
    %c0_9 = arith.constant 0 : index
    %23 = vector.load %arg4[%c0_8, %c0_9] : memref<8x1xi32, #tpu.memory_space<vmem>>, vector<8x1xi32>
    %24 = vector.broadcast %23 : vector<8x1xi32> to vector<8x16xi32>
    %25 = arith.cmpi eq, %22, %24 : vector<8x16xi32>
    %cst_10 = arith.constant 6.000000e+00 : f32
    %26 = vector.broadcast %cst_10 : f32 to vector<8x16xf32>
    %27 = arith.subf %18, %26 : vector<8x16xf32>
    %28 = arith.select %25, %27, %18 : vector<8x16xi1>, vector<8x16xf32>
    %c0_11 = arith.constant 0 : index
    %c0_12 = arith.constant 0 : index
    %c0_13 = arith.constant 0 : index
    %29 = vector.load %arg6[%c0_11, %c0_12, %c0_13] : memref<1x8x1xf32, #tpu.memory_space<vmem>>, vector<1x8x1xf32>
    %30 = vector.shape_cast %29 : vector<1x8x1xf32> to vector<8x1xf32>
    %cst_14 = arith.constant dense<0xFF800000> : vector<8xf32>
    %31 = vector.multi_reduction <maximumf>, %28, %cst_14 [1] : vector<8x16xf32> to vector<8xf32>
    %32 = vector.shape_cast %31 : vector<8xf32> to vector<8x1xf32>
    %33 = arith.maximumf %30, %32 : vector<8x1xf32>
    %34 = arith.subf %30, %33 : vector<8x1xf32>
    %35 = math.exp %34 : vector<8x1xf32>
    %c0_15 = arith.constant 0 : index
    %c0_16 = arith.constant 0 : index
    %c0_17 = arith.constant 0 : index
    %36 = vector.load %arg7[%c0_15, %c0_16, %c0_17] : memref<1x8x1xf32, #tpu.memory_space<vmem>>, vector<1x8x1xf32>
    %37 = vector.shape_cast %36 : vector<1x8x1xf32> to vector<8x1xf32>
    %38 = arith.mulf %35, %37 : vector<8x1xf32>
    %39 = vector.broadcast %33 : vector<8x1xf32> to vector<8x16xf32>
    %40 = arith.subf %28, %39 : vector<8x16xf32>
    %41 = math.exp %40 : vector<8x16xf32>
    %cst_18 = arith.constant dense<0.000000e+00> : vector<8xf32>
    %42 = vector.multi_reduction <add>, %41, %cst_18 [1] : vector<8x16xf32> to vector<8xf32>
    %43 = vector.shape_cast %42 : vector<8xf32> to vector<8x1xf32>
    %44 = arith.addf %38, %43 : vector<8x1xf32>
    %c0_19 = arith.constant 0 : index
    %c0_20 = arith.constant 0 : index
    %c0_21 = arith.constant 0 : index
    %45 = vector.load %arg7[%c0_19, %c0_20, %c0_21] : memref<1x8x1xf32, #tpu.memory_space<vmem>>, vector<1x8x1xf32>
    %46 = vector.shape_cast %45 : vector<1x8x1xf32> to vector<8x1xf32>
    %47 = vector.shape_cast %44 : vector<8x1xf32> to vector<1x8x1xf32>
    tpu.vector_store %arg7[%c0_19, %c0_20, %c0_21], %47 {strides = array<i32>} : memref<1x8x1xf32, #tpu.memory_space<vmem>>, vector<1x8x1xf32>,
    %c0_22 = arith.constant 0 : index
    %c0_23 = arith.constant 0 : index
    %c0_24 = arith.constant 0 : index
    %48 = vector.load %arg6[%c0_22, %c0_23, %c0_24] : memref<1x8x1xf32, #tpu.memory_space<vmem>>, vector<1x8x1xf32>
    %49 = vector.shape_cast %48 : vector<1x8x1xf32> to vector<8x1xf32>
    %50 = vector.shape_cast %33 : vector<8x1xf32> to vector<1x8x1xf32>
    tpu.vector_store %arg6[%c0_22, %c0_23, %c0_24], %50 {strides = array<i32>} : memref<1x8x1xf32, #tpu.memory_space<vmem>>, vector<1x8x1xf32>,
    %c0_25 = arith.constant 0 : index
    %c0_26 = arith.constant 0 : index
    %c0_27 = arith.constant 0 : index
    %51 = vector.load %arg8[%c0_25, %c0_26, %c0_27] : memref<1x8x1xf32, #tpu.memory_space<vmem>>, vector<1x8x1xf32>
    %52 = vector.shape_cast %51 : vector<1x8x1xf32> to vector<8x1xf32>
    %cst_28 = arith.constant 0.000000e+00 : f32
    %53 = vector.broadcast %cst_28 : f32 to vector<8x16xf32>
    %54 = arith.select %25, %28, %53 : vector<8x16xi1>, vector<8x16xf32>
    %cst_29 = arith.constant dense<0.000000e+00> : vector<8xf32>
    %55 = vector.multi_reduction <add>, %54, %cst_29 [1] : vector<8x16xf32> to vector<8xf32>
    %56 = vector.shape_cast %55 : vector<8xf32> to vector<8x1xf32>
    %57 = arith.addf %52, %56 : vector<8x1xf32>
    %c0_30 = arith.constant 0 : index
    %c0_31 = arith.constant 0 : index
    %c0_32 = arith.constant 0 : index
    %58 = vector.load %arg8[%c0_30, %c0_31, %c0_32] : memref<1x8x1xf32, #tpu.memory_space<vmem>>, vector<1x8x1xf32>
    %59 = vector.shape_cast %58 : vector<1x8x1xf32> to vector<8x1xf32>
    %60 = vector.shape_cast %57 : vector<8x1xf32> to vector<1x8x1xf32>
    tpu.vector_store %arg8[%c0_30, %c0_31, %c0_32], %60 {strides = array<i32>} : memref<1x8x1xf32, #tpu.memory_space<vmem>>, vector<1x8x1xf32>,
    return
  }
  func.func @transform_0(%arg0: i32, %arg1: i32) -> (i32, i32) {
    %c0_i32 = arith.constant 0 : i32
    %c0_i32_0 = arith.constant 0 : i32
    %c0_i32_1 = arith.constant 0 : i32
    return %c0_i32, %c0_i32_0 : i32, i32
  }
  func.func @transform_1(%arg0: i32, %arg1: i32) -> (i32, i32) {
    %c0_i32 = arith.constant 0 : i32
    %c0_i32_0 = arith.constant 0 : i32
    %c0_i32_1 = arith.constant 0 : i32
    return %c0_i32, %c0_i32_0 : i32, i32
  }
  func.func @transform_2(%arg0: i32, %arg1: i32) -> (i32, i32) {
    %c0_i32 = arith.constant 0 : i32
    %c0_i32_0 = arith.constant 0 : i32
    %c0_i32_1 = arith.constant 0 : i32
    return %c0_i32, %c0_i32_0 : i32, i32
  }
  func.func @transform_3(%arg0: i32, %arg1: i32) -> (i32, i32) {
    %c1_i32 = arith.constant 1 : i32
    %0 = arith.muli %arg0, %c1_i32 : i32
    %1 = arith.addi %0, %arg1 : i32
    %c0_i32 = arith.constant 0 : i32
    %2 = arith.minsi %1, %c0_i32 : i32
    %c0_i32_0 = arith.constant 0 : i32
    %c0_i32_1 = arith.constant 0 : i32
    return %2, %c0_i32_0 : i32, i32
  }
  func.func @transform_4(%arg0: i32, %arg1: i32) -> (i32, i32, i32) {
    %c0_i32 = arith.constant 0 : i32
    %c0_i32_0 = arith.constant 0 : i32
    %c0_i32_1 = arith.constant 0 : i32
    return %arg0, %c0_i32, %c0_i32_0 : i32, i32, i32
  }
  func.func @transform_5(%arg0: i32, %arg1: i32) -> (i32, i32, i32) {
    %c0_i32 = arith.constant 0 : i32
    %c0_i32_0 = arith.constant 0 : i32
    %c0_i32_1 = arith.constant 0 : i32
    return %arg0, %c0_i32, %c0_i32_0 : i32, i32, i32
  }
  func.func @transform_6(%arg0: i32, %arg1: i32) -> (i32, i32, i32) {
    %c0_i32 = arith.constant 0 : i32
    %c0_i32_0 = arith.constant 0 : i32
    %c0_i32_1 = arith.constant 0 : i32
    return %arg0, %c0_i32, %c0_i32_0 : i32, i32, i32
  }
}

</mosaic_0001>

<bundles_post_ra>
// kernel: tpu_custom_call.1
= control target key start
LH: loop header
LB: loop body
LE: loop exit
PB: predicated region body
PF: predicated region fallthrough
CT: control target
= control target key end

     0   :  { %12 = vsyncpa [#allocation3], 0  ;;  %s275_s24 = smov [#allocation2]   ;;  %s365_s0 = inlined_call_operand.hbm [shape: f32[8,32], index: 0, kind: input, shape index: {}]   ;;  %s366_s1 = inlined_call_operand.vmem [shape: f32[8,1], index: 1, kind: input, shape index: {}]   ;;  %s367_s2 = inlined_call_operand.vmem [shape: s32[8,1], index: 2, kind: input, shape index: {}]   ;;  %s368_s3 = inlined_call_operand.vmem [shape: f32[16,32], index: 3, kind: input, shape index: {}]   ;;  %s369_s4 = inlined_call_operand.vmem [shape: f32[1,8,1], index: 4, kind: output, shape index: {0}]   ;;  %s370_s5 = inlined_call_operand.vmem [shape: f32[1,8,1], index: 5, kind: output, shape index: {1}]   ;;  %s371_s6 = inlined_call_operand.vmem [shape: f32[1,8,1], index: 6, kind: output, shape index: {2}]  }
   0x1   :  { %s18_s23 = sshll.u32 %s365_s0, 4  ;;  %s20_s25 = sshll.u32 %s275_s24, 4  ;;  %s19_s23 = int_to_ptr.hbm [resolvable:$true] %s18_s23  ;;  %s21_s25 = int_to_ptr.vmem [resolvable:$true] %s20_s25 }
   0x2   :  { %23 = dma.hbm_to_vmem [thread:$0]  %s19_s23, 128, %s21_s25, [#allocation3]  }
   0x3   :  { %273 = dma.done.wait [#allocation3], 128  }
   0x4   :  { %274 = vsyncadd [#allocation3], 4294967168  ;;  %v276_v0 = vmov 0   ;;  %v75_v1 = vld [vmem:[%s368_s3] sm:$0xff]  ;;  %vm79_vm0 = vcmask 261120   ;;  %v76_v2 = vld [vmem:[%s368_s3 + $0x8] sm:$0xff]  ;;  %v147_v22 = vlaneseq }
   0x5   :  { %238 = vset.pattern.permute.xlu1 %v276_v0  ;;  %239 = vset.pattern.permute.xlu2 %v276_v0  ;;  %v77_v3 = vmul.f32 %v75_v1, %v75_v1  ;;  %v138_v4 = vld [vmem:[%s366_s1] sm:$0xff]  ;;  %v78_v6 = vmul.f32 %v76_v2, %v76_v2  ;;  %vm71_vm1 = vcmask 7168   ;;  %v277_v12 = vmov 0.0  }
   0x6   :  { %240 = vset.pattern.permute.xlu0 %v276_v0  ;;  %230 = vmatpush.xpose.msk.msra.mxu0 %vm79_vm0, %v76_v2  ;;  %v108_v7 = vld [vmem:[#allocation2] sm:$0xff]  ;;  %74 = vst.msk [vmem:[%s371_s6] sm:$0xff] %vm71_vm1, %v277_v12  ;;  %v148_v27 = vand.u32 127, %v147_v22  ;;  %vm152_vm8 = vcmask 130112   ;;  %vm179_vm9 = vcmask 130048   ;;  %v278_v45 = vmov -inf  }
   0x7   :  { %141 = vperm.xlu1 %238, %v138_v4   ;;  %v80_v5 = vsel %vm79_vm0, %v77_v3, 0.0  ;;  %v171_v8 = vld [vmem:[%s367_s2] sm:$0xff]  ;;  %v83_v9 = vsel %vm79_vm0, %v78_v6, 0.0  ;;  %73 = vst.msk [vmem:[%s370_s5] sm:$0xff] %vm71_vm1, %v277_v12 }
   0x8   :  { %81 = vadd.xlane.f32.xlu0 %v80_v5  ;;  %v150_v29 = vadd.s32 4294967288, %v148_v27  ;;  %72 = vst.msk [vmem:[%s369_s4] sm:$0xff] %vm71_vm1, %v278_v45 }
   0xa   :  { %231 = vmatpush.xpose.msk.msra.mxu0 %vm79_vm0, %v75_v1 }
   0xd   :  { %232 = vmatmul.msk.f32.vlgmr.msra.gmra.mxu0 %vm79_vm0, %v108_v7  ;;  %v204_v46 = vld [vmem:[%s371_s6] sm:$0xff] }
   0xe   :  { %v187_v60 = vld [vmem:[%s370_s5] sm:$0xff] }
   0xf   :  { %173 = vperm.xlu1 %238, %v171_v8   ;;  %v178_v47 = vld [vmem:[%s369_s4] sm:$0xff] }
  0x10   :  { %84 = vadd.xlane.f32.xlu0 %v83_v9 }
  0x79   :  { %v142_v26 = vpop.permute.xlu1 %141 }
  0x7b   :  { %v82_v10 = vpop.xlane.xlu0 %81 }
  0x7c   :  { %v86_v11 = vmax.f32 %v82_v10, 1e-24 }
  0x7e   :  { %241 = vrsqrt.f32 %v86_v11  ;;  %vm94_vm3 = vweird.f32 %v86_v11 }
  0x81   :  { %v174_v38 = vpop.permute.xlu1 %173 }
  0x82   :  { %vm175_vm10 = vcmp.eq.s32.totalorder %v148_v27, %v174_v38 }
  0x83   :  { %v85_v13 = vpop.xlane.xlu0 %84 }
  0x84   :  { %v242_v14 = vpop.eup %241  ;;  %v87_v15 = vmax.f32 %v85_v13, 1e-24 }
  0x85   :  { %v89_v16 = vmul.f32 %v242_v14, %v86_v11  ;;  %vm95_vm2 = vweird.f32 %v242_v14 }
  0x86   :  { %243 = vrsqrt.f32 %v87_v15  ;;  %vm96_vm5 = vmor %vm94_vm3, %vm95_vm2  ;;  %vm104_vm6 = vweird.f32 %v87_v15 }
  0x87   :  { %v90_v17 = vmul.f32 %v242_v14, %v89_v16 }
  0x89   :  { %v91_v18 = vmul.f32 0.5, %v90_v17 }
  0x8a   :  { %v135_v32 = vpop.f32.mrf.mxu0 }
  0x8b   :  { %v92_v20 = vsub.f32 1.5, %v91_v18  ;;  %v144_v36 = vmul.f32 %v142_v26, %v135_v32 }
  0x8c   :  { %v244_v19 = vpop.eup %243 }
  0x8d   :  { %v99_v21 = vmul.f32 %v244_v19, %v87_v15  ;;  %v93_v24 = vmul.f32 %v242_v14, %v92_v20  ;;  %vm105_vm4 = vweird.f32 %v244_v19 }
  0x8e   :  { %vm106_vm7 = vmor %vm104_vm6, %vm105_vm4 }
  0x8f   :  { %v100_v23 = vmul.f32 %v244_v19, %v99_v21  ;;  %v97_v30 = vsel %vm96_vm5, %v242_v14, %v93_v24 }
  0x90   :  { %v149_v34 = vperm.slane %v97_v30, %v148_v27 }
  0x91   :  { %v101_v25 = vmul.f32 0.5, %v100_v23 }
  0x93   :  { %v102_v28 = vsub.f32 1.5, %v101_v25 }
  0x95   :  { %v103_v31 = vmul.f32 %v244_v19, %v102_v28 }
  0x97   :  { %v107_v33 = vsel %vm106_vm7, %v244_v19, %v103_v31 }
  0x98   :  { %v151_v35 = vperm.slane %v107_v33, %v150_v29 }
  0x9a   :  { %v153_v37 = vsel %vm152_vm8, %v151_v35, %v149_v34 }
  0x9b   :  { %v167_v39 = vmul.f32 %v153_v37, %v144_v36 }
  0x9d   :  { %v233_v40 = vadd.f32 -6.0, %v167_v39 }
  0x9f   :  { %v205_v41 = vsel %vm175_vm10, %v233_v40, 0.0  ;;  %v177_v42 = vsel %vm175_vm10, %v233_v40, %v167_v39 }
  0xa0   :  { %v206_v43 = vsel %vm179_vm9, %v205_v41, 0.0  ;;  %v180_v44 = vsel %vm179_vm9, %v177_v42, -inf }
  0xa1   :  { %207 = vadd.xlane.f32.xlu1 %v206_v43  ;;  %181 = vmax.xlane.f32.xlu2 %v180_v44 }
 0x114   :  { %v208_v48 = vpop.xlane.xlu1 %207  ;;  %v182_v49 = vpop.xlane.xlu2 %181 }
 0x115   :  { %v209_v50 = vadd.f32 %v208_v48, %v204_v46  ;;  %v183_v51 = vmax.f32 %v178_v47, %v182_v49 }
 0x117   :  { %210 = vst.msk [vmem:[%s371_s6] sm:$0xff] %vm71_vm1, %v209_v50  ;;  %v184_v52 = vsub.f32 %v178_v47, %v183_v51  ;;  %191 = vperm.xlu2 %239, %v183_v51  }
 0x118   :  { %203 = vst.msk [vmem:[%s369_s4] sm:$0xff] %vm71_vm1, %v183_v51 }
 0x119   :  { %v185_v58 = vmul.f32 1.442695, %v184_v52 }
 0x171   :  { %v192_v53 = vpop.permute.xlu2 %191 }
 0x172   :  { %v194_v54 = vsub.f32 %v177_v42, %v192_v53 }
 0x174   :  { %v195_v55 = vmul.f32 1.442695, %v194_v54 }
 0x176   :  { %245 = vpow2.f32 %v195_v55 }
 0x177   :  { %247 = vpow2.f32 %v185_v58 }
 0x17c   :  { %v246_v56 = vpop.eup %245 }
 0x17d   :  { %v197_v57 = vsel %vm179_vm9, %v246_v56, 0.0  ;;  %v248_v59 = vpop.eup %247 }
 0x17e   :  { %198 = vadd.xlane.f32.xlu0 %v197_v57  ;;  %v188_v61 = vmul.f32 %v248_v59, %v187_v60 }
 0x1f1   :  { %v199_v62 = vpop.xlane.xlu0 %198 }
 0x1f2   :  { %v200_v63 = vadd.f32 %v199_v62, %v188_v61 }
 0x1f4   :  { %202 = vst.msk [vmem:[%s370_s5] sm:$0xff] %vm71_vm1, %v200_v63 }
 0x1f5   :  { %223 = vsyncpa [#allocation3], 1 }

</bundles_post_ra>
